<compile_context>
chip_gen: v6e
topology: v6e:2x2x1
jax: 0.10.0
libtpu: 0.0.40
codegen_flags: <defaults>
</compile_context>

<pallas_src>
import jax
import jax.numpy as jnp
from jax.experimental import pallas as pl
from jax.experimental.pallas import tpu as pltpu

LANE = 128        # lane width (last-dim tiling quantum)
SUBLANE = 8       # sublane quantum (second-to-last dim)
MAX_TILE_B = 512  # largest batch tile streamed per grid step
MIN_SPLIT_B = 128 # if B >= 2*MIN_SPLIT_B, use >=2 grid steps (v7x dual-core)


def _round_up(n, m):
    return ((n + m - 1) // m) * m


def mlp_kernel(x_ref, w1_ref, b1_ref, w2_ref, b2_ref, w3_ref, b3_ref, o_ref):
    # Layer 1: x @ W1 + b1, ReLU  (MXU matmul, f32 accumulate, f32 epilogue)
    h = jnp.dot(x_ref[...], w1_ref[...], preferred_element_type=jnp.float32)
    h = jnp.maximum(h + b1_ref[...], 0.0)
    # Layer 2: h @ W2 + b2, ReLU
    h = jnp.dot(h.astype(w2_ref.dtype), w2_ref[...],
                preferred_element_type=jnp.float32)
    h = jnp.maximum(h + b2_ref[...], 0.0)
    # Layer 3: h @ W3 + b3 (no activation); lane-dense store (out dim padded to 128)
    out = jnp.dot(h.astype(w3_ref.dtype), w3_ref[...],
                  preferred_element_type=jnp.float32) + b3_ref[...]
    o_ref[...] = out.astype(o_ref.dtype)


def prepare_params(w1, b1, w2, b2, w3, b3, *, compute_dtype=jnp.bfloat16):
    """One-time parameter prep (outside the hot path).

    - Weights: stored [in, out] (transpose of PyTorch's [out, in]); cast to the
      MXU compute dtype (bf16 by default, f32 accumulation in-kernel).
    - Only the OUTPUT feature dim of fc3 is padded to a lane multiple so the
      kernel's final store is unmasked / lane-dense.  Zero-padding is exact.
    - Biases stay f32 (epilogue runs in f32 on every TPU generation).
    Returns (params_tuple, out_size).
    """
    out_size = w3.shape[1]
    out_p = _round_up(out_size, LANE)
    b1 = b1.reshape(1, -1)
    b2 = b2.reshape(1, -1)
    b3 = b3.reshape(1, -1)
    if out_p != out_size:
        w3 = jnp.pad(w3, ((0, 0), (0, out_p - out_size)))
        b3 = jnp.pad(b3, ((0, 0), (0, out_p - out_size)))

    def cast(a):
        return a if a.dtype == compute_dtype else a.astype(compute_dtype)

    params = (cast(w1), b1.astype(jnp.float32),
              cast(w2), b2.astype(jnp.float32),
              cast(w3), b3.astype(jnp.float32))
    return params, out_size


def mlp_forward(x, params, out_size, *, tile_b=None):
    """x: [B, in_size] (any float dtype); params from prepare_params()."""
    w1, b1, w2, b2, w3, b3 = params
    compute_dtype = w1.dtype
    out_dtype = x.dtype
    B, in_size = x.shape
    h1, h2, out_p = w1.shape[1], w2.shape[1], w3.shape[1]

    # ---- batch tiling: balanced tiles, >=2 steps when B is large enough ----
    if tile_b is None:
        n_tiles = max(pl.cdiv(B, MAX_TILE_B),
                      2 if B >= 2 * MIN_SPLIT_B else 1)
        if n_tiles == 1:
            tile_b = B  # full-extent block: no batch padding, no (8,) constraint
        else:
            tile_b = _round_up(pl.cdiv(B, n_tiles), SUBLANE)
    elif tile_b != B and tile_b % SUBLANE:
        tile_b = _round_up(tile_b, SUBLANE)  # keep the (8,128)/full-dim rule
    b_p = _round_up(B, tile_b)
    grid_b = b_p // tile_b

    # ---- minimal wrapper ops: cast only if needed, pad batch only if needed ----
    if x.dtype != compute_dtype:
        x = x.astype(compute_dtype)
    if b_p != B:
        x = jnp.pad(x, ((0, b_p - B), (0, 0)))

    # ---- VMEM budget (conservative) ----
    cdt = jnp.dtype(compute_dtype).itemsize
    odt = jnp.dtype(out_dtype).itemsize
    resident_bytes = ((w1.size + w2.size + w3.size) * cdt          # Buffered(1)
                      + (b1.size + b2.size + b3.size) * 4)
    stream_bytes = 2 * tile_b * (in_size * cdt + out_p * odt)      # double-buffered x/out
    interm_bytes = tile_b * (h1 + h2) * 4                          # both f32 intermediates
    vmem_est = int(1.25 * (resident_bytes + stream_bytes + interm_bytes)) + (2 << 20)
    try:
        vmem_cap = int(pltpu.get_tpu_info().vmem_capacity_bytes)
    except Exception:
        vmem_cap = 64 << 20  # assume the most restrictive generation (v7x)
    vmem_limit = int(min(max(vmem_est, 32 << 20), vmem_cap - (8 << 20)))
    # TODO(synk): add a K/N-tiled accumulator fallback (pl.when init/finalize or
    # per-layer calls) for hidden sizes whose resident weights exceed usable VMEM
    # (binding mainly on v7x's 64 MiB); not needed at these shapes.

    def build(single_buffer):
        def resident(shape):
            kwargs = {}
            if single_buffer:
                # constant index_map -> never re-DMAed; one VMEM buffer is enough
                kwargs["pipeline_mode"] = pl.Buffered(1)
            return pl.BlockSpec(shape, lambda i: (0, 0), **kwargs)

        return pl.pallas_call(
            mlp_kernel,
            out_shape=jax.ShapeDtypeStruct((b_p, out_p), out_dtype),
            grid_spec=pltpu.PrefetchScalarGridSpec(
                num_scalar_prefetch=0,
                grid=(grid_b,),
                in_specs=[
                    pl.BlockSpec((tile_b, in_size), lambda i: (i, 0)),  # x streams
                    resident(w1.shape), resident(b1.shape),
                    resident(w2.shape), resident(b2.shape),
                    resident(w3.shape), resident(b3.shape),
                ],
                out_specs=pl.BlockSpec((tile_b, out_p), lambda i: (i, 0)),
            ),
            compiler_params=pltpu.CompilerParams(
                dimension_semantics=("parallel",),
                vmem_limit_bytes=vmem_limit),
        )

    try:
        out_padded = build(single_buffer=True)(x, w1, b1, w2, b2, w3, b3)
    except Exception:
        # Fallback if this jax/libtpu rejects pipeline_mode=pl.Buffered(1).
        out_padded = build(single_buffer=False)(x, w1, b1, w2, b2, w3, b3)

    if b_p != B or out_p != out_size:
        out_padded = out_padded[:B, :out_size]
    return out_padded


def init_linear_params(key, in_features, out_features):
    """PyTorch nn.Linear default init: U(-1/sqrt(fan_in), 1/sqrt(fan_in))."""
    kw, kb = jax.random.split(key)
    bound = 1.0 / jnp.sqrt(jnp.float32(in_features))
    # stored as [in, out] (transpose of PyTorch's [out, in]) for lane-dense x @ W
    w = jax.random.uniform(kw, (in_features, out_features), jnp.float32, -bound, bound)
    b = jax.random.uniform(kb, (1, out_features), jnp.float32, -bound, bound)
    return w, b


if __name__ == "__main__":
    input_size, hidden_size, output_size = 32, 64, 8
    batch = 16

    key = jax.random.PRNGKey(0)
    kx, k1, k2, k3 = jax.random.split(key, 4)

    x = jax.random.normal(kx, (batch, input_size), jnp.float32)
    w1, b1 = init_linear_params(k1, input_size, hidden_size)
    w2, b2 = init_linear_params(k2, hidden_size, hidden_size)
    w3, b3 = init_linear_params(k3, hidden_size, output_size)

    # pure-JAX reference
    h1r = jnp.maximum(x @ w1 + b1, 0.0)
    h2r = jnp.maximum(h1r @ w2 + b2, 0.0)
    ref = h2r @ w3 + b3

    # f32 path: bit-tight check vs reference
    params_f32, out_size = prepare_params(w1, b1, w2, b2, w3, b3,
                                          compute_dtype=jnp.float32)
    out_f32 = jax.block_until_ready(mlp_forward(x, params_f32, out_size))
    assert out_f32.shape == (batch, output_size)
    assert jnp.allclose(out_f32, ref, atol=1e-5, rtol=1e-5), "f32 mismatch"

    # default path: bf16 matmul operands, f32 accumulation + epilogue
    params_bf16, out_size = prepare_params(w1, b1, w2, b2, w3, b3)
    out_bf16 = jax.block_until_ready(mlp_forward(x, params_bf16, out_size))
    assert out_bf16.shape == (batch, output_size)
    assert jnp.allclose(out_bf16, ref, atol=5e-2, rtol=5e-2), "bf16 mismatch"

    print("KERNEL_OK")
</pallas_src>

<mosaic_0001>
module attributes {stable_mosaic.version = 11 : i64} {
  func.func @mlp_kernel(%arg0: i32, %arg1: memref<16x32xf32, #tpu.memory_space<vmem>>, %arg2: memref<32x64xf32, #tpu.memory_space<vmem>>, %arg3: memref<1x64xf32, #tpu.memory_space<vmem>>, %arg4: memref<64x64xf32, #tpu.memory_space<vmem>>, %arg5: memref<1x64xf32, #tpu.memory_space<vmem>>, %arg6: memref<64x128xf32, #tpu.memory_space<vmem>>, %arg7: memref<1x128xf32, #tpu.memory_space<vmem>>, %arg8: memref<16x128xf32, #tpu.memory_space<vmem>>) attributes {dimension_semantics = [#tpu.dimension_semantics<parallel>], iteration_bounds = array<i64: 1>, scalar_prefetch = 0 : i64, scratch_operands = 0 : i64, tpu.core_type = #tpu.core_type<tc>, window_params = [{transform_indices = @transform_0, window_bounds = array<i64: 16, 32>}, {pipeline_mode = #tpu.pipeline_mode<synchronous>, transform_indices = @transform_1, window_bounds = array<i64: 32, 64>}, {pipeline_mode = #tpu.pipeline_mode<synchronous>, transform_indices = @transform_2, window_bounds = array<i64: 1, 64>}, {pipeline_mode = #tpu.pipeline_mode<synchronous>, transform_indices = @transform_3, window_bounds = array<i64: 64, 64>}, {pipeline_mode = #tpu.pipeline_mode<synchronous>, transform_indices = @transform_4, window_bounds = array<i64: 1, 64>}, {pipeline_mode = #tpu.pipeline_mode<synchronous>, transform_indices = @transform_5, window_bounds = array<i64: 64, 128>}, {pipeline_mode = #tpu.pipeline_mode<synchronous>, transform_indices = @transform_6, window_bounds = array<i64: 1, 128>}, {transform_indices = @transform_7, window_bounds = array<i64: 16, 128>}]} {
    %c0 = arith.constant 0 : index
    %c0_0 = arith.constant 0 : index
    %0 = vector.load %arg1[%c0, %c0_0] : memref<16x32xf32, #tpu.memory_space<vmem>>, vector<16x32xf32>
    %c0_1 = arith.constant 0 : index
    %c0_2 = arith.constant 0 : index
    %1 = vector.load %arg2[%c0_1, %c0_2] : memref<32x64xf32, #tpu.memory_space<vmem>>, vector<32x64xf32>
    %cst = arith.constant dense<0.000000e+00> : vector<16x64xf32>
    %2 = tpu.matmul %0, %1, %cst {dimension_numbers = #tpu.dot_dimension_numbers<[1], [0], [0], [1], [0, 0, 1, 1], [], []>} : vector<16x32xf32>, vector<32x64xf32>, vector<16x64xf32> -> vector<16x64xf32>
    %c0_3 = arith.constant 0 : index
    %c0_4 = arith.constant 0 : index
    %3 = vector.load %arg3[%c0_3, %c0_4] : memref<1x64xf32, #tpu.memory_space<vmem>>, vector<1x64xf32>
    %4 = vector.broadcast %3 : vector<1x64xf32> to vector<16x64xf32>
    %5 = arith.addf %2, %4 : vector<16x64xf32>
    %cst_5 = arith.constant 0.000000e+00 : f32
    %6 = vector.broadcast %cst_5 : f32 to vector<16x64xf32>
    %7 = arith.maximumf %5, %6 : vector<16x64xf32>
    %c0_6 = arith.constant 0 : index
    %c0_7 = arith.constant 0 : index
    %8 = vector.load %arg4[%c0_6, %c0_7] : memref<64x64xf32, #tpu.memory_space<vmem>>, vector<64x64xf32>
    %cst_8 = arith.constant dense<0.000000e+00> : vector<16x64xf32>
    %9 = tpu.matmul %7, %8, %cst_8 {dimension_numbers = #tpu.dot_dimension_numbers<[1], [0], [0], [1], [0, 0, 1, 1], [], []>} : vector<16x64xf32>, vector<64x64xf32>, vector<16x64xf32> -> vector<16x64xf32>
    %c0_9 = arith.constant 0 : index
    %c0_10 = arith.constant 0 : index
    %10 = vector.load %arg5[%c0_9, %c0_10] : memref<1x64xf32, #tpu.memory_space<vmem>>, vector<1x64xf32>
    %11 = vector.broadcast %10 : vector<1x64xf32> to vector<16x64xf32>
    %12 = arith.addf %9, %11 : vector<16x64xf32>
    %cst_11 = arith.constant 0.000000e+00 : f32
    %13 = vector.broadcast %cst_11 : f32 to vector<16x64xf32>
    %14 = arith.maximumf %12, %13 : vector<16x64xf32>
    %c0_12 = arith.constant 0 : index
    %c0_13 = arith.constant 0 : index
    %15 = vector.load %arg6[%c0_12, %c0_13] : memref<64x128xf32, #tpu.memory_space<vmem>>, vector<64x128xf32>
    %cst_14 = arith.constant dense<0.000000e+00> : vector<16x128xf32>
    %16 = tpu.matmul %14, %15, %cst_14 {dimension_numbers = #tpu.dot_dimension_numbers<[1], [0], [0], [1], [0, 0, 1, 1], [], []>} : vector<16x64xf32>, vector<64x128xf32>, vector<16x128xf32> -> vector<16x128xf32>
    %c0_15 = arith.constant 0 : index
    %c0_16 = arith.constant 0 : index
    %17 = vector.load %arg7[%c0_15, %c0_16] : memref<1x128xf32, #tpu.memory_space<vmem>>, vector<1x128xf32>
    %18 = vector.broadcast %17 : vector<1x128xf32> to vector<16x128xf32>
    %19 = arith.addf %16, %18 : vector<16x128xf32>
    %c0_17 = arith.constant 0 : index
    %c0_18 = arith.constant 0 : index
    %20 = vector.load %arg8[%c0_17, %c0_18] : memref<16x128xf32, #tpu.memory_space<vmem>>, vector<16x128xf32>
    tpu.vector_store %arg8[%c0_17, %c0_18], %19 {strides = array<i32>} : memref<16x128xf32, #tpu.memory_space<vmem>>, vector<16x128xf32>,
    return
  }
  func.func @transform_0(%arg0: i32) -> (i32, i32) {
    %c0_i32 = arith.constant 0 : i32
    %c0_i32_0 = arith.constant 0 : i32
    return %arg0, %c0_i32 : i32, i32
  }
  func.func @transform_1(%arg0: i32) -> (i32, i32) {
    %c0_i32 = arith.constant 0 : i32
    %c0_i32_0 = arith.constant 0 : i32
    %c0_i32_1 = arith.constant 0 : i32
    return %c0_i32, %c0_i32_0 : i32, i32
  }
  func.func @transform_2(%arg0: i32) -> (i32, i32) {
    %c0_i32 = arith.constant 0 : i32
    %c0_i32_0 = arith.constant 0 : i32
    %c0_i32_1 = arith.constant 0 : i32
    return %c0_i32, %c0_i32_0 : i32, i32
  }
  func.func @transform_3(%arg0: i32) -> (i32, i32) {
    %c0_i32 = arith.constant 0 : i32
    %c0_i32_0 = arith.constant 0 : i32
    %c0_i32_1 = arith.constant 0 : i32
    return %c0_i32, %c0_i32_0 : i32, i32
  }
  func.func @transform_4(%arg0: i32) -> (i32, i32) {
    %c0_i32 = arith.constant 0 : i32
    %c0_i32_0 = arith.constant 0 : i32
    %c0_i32_1 = arith.constant 0 : i32
    return %c0_i32, %c0_i32_0 : i32, i32
  }
  func.func @transform_5(%arg0: i32) -> (i32, i32) {
    %c0_i32 = arith.constant 0 : i32
    %c0_i32_0 = arith.constant 0 : i32
    %c0_i32_1 = arith.constant 0 : i32
    return %c0_i32, %c0_i32_0 : i32, i32
  }
  func.func @transform_6(%arg0: i32) -> (i32, i32) {
    %c0_i32 = arith.constant 0 : i32
    %c0_i32_0 = arith.constant 0 : i32
    %c0_i32_1 = arith.constant 0 : i32
    return %c0_i32, %c0_i32_0 : i32, i32
  }
  func.func @transform_7(%arg0: i32) -> (i32, i32) {
    %c0_i32 = arith.constant 0 : i32
    %c0_i32_0 = arith.constant 0 : i32
    return %arg0, %c0_i32 : i32, i32
  }
}

module attributes {stable_mosaic.version = 11 : i64} {
  func.func @mlp_kernel(%arg0: i32, %arg1: memref<16x32xf32, #tpu.memory_space<vmem>>, %arg2: memref<32x64xf32, #tpu.memory_space<vmem>>, %arg3: memref<1x64xf32, #tpu.memory_space<vmem>>, %arg4: memref<64x64xf32, #tpu.memory_space<vmem>>, %arg5: memref<1x64xf32, #tpu.memory_space<vmem>>, %arg6: memref<64x128xf32, #tpu.memory_space<vmem>>, %arg7: memref<1x128xf32, #tpu.memory_space<vmem>>, %arg8: memref<16x128xf32, #tpu.memory_space<vmem>>) attributes {dimension_semantics = [#tpu.dimension_semantics<parallel>], iteration_bounds = array<i64: 1>, scalar_prefetch = 0 : i64, scratch_operands = 0 : i64, tpu.core_type = #tpu.core_type<tc>, window_params = [{transform_indices = @transform_0, window_bounds = array<i64: 16, 32>}, {pipeline_mode = #tpu.pipeline_mode<synchronous>, transform_indices = @transform_1, window_bounds = array<i64: 32, 64>}, {pipeline_mode = #tpu.pipeline_mode<synchronous>, transform_indices = @transform_2, window_bounds = array<i64: 1, 64>}, {pipeline_mode = #tpu.pipeline_mode<synchronous>, transform_indices = @transform_3, window_bounds = array<i64: 64, 64>}, {pipeline_mode = #tpu.pipeline_mode<synchronous>, transform_indices = @transform_4, window_bounds = array<i64: 1, 64>}, {pipeline_mode = #tpu.pipeline_mode<synchronous>, transform_indices = @transform_5, window_bounds = array<i64: 64, 128>}, {pipeline_mode = #tpu.pipeline_mode<synchronous>, transform_indices = @transform_6, window_bounds = array<i64: 1, 128>}, {transform_indices = @transform_7, window_bounds = array<i64: 16, 128>}]} {
    %c0 = arith.constant 0 : index
    %c0_0 = arith.constant 0 : index
    %0 = vector.load %arg1[%c0, %c0_0] : memref<16x32xf32, #tpu.memory_space<vmem>>, vector<16x32xf32>
    %c0_1 = arith.constant 0 : index
    %c0_2 = arith.constant 0 : index
    %1 = vector.load %arg2[%c0_1, %c0_2] : memref<32x64xf32, #tpu.memory_space<vmem>>, vector<32x64xf32>
    %cst = arith.constant dense<0.000000e+00> : vector<16x64xf32>
    %2 = tpu.matmul %0, %1, %cst {dimension_numbers = #tpu.dot_dimension_numbers<[1], [0], [0], [1], [0, 0, 1, 1], [], []>} : vector<16x32xf32>, vector<32x64xf32>, vector<16x64xf32> -> vector<16x64xf32>
    %c0_3 = arith.constant 0 : index
    %c0_4 = arith.constant 0 : index
    %3 = vector.load %arg3[%c0_3, %c0_4] : memref<1x64xf32, #tpu.memory_space<vmem>>, vector<1x64xf32>
    %4 = vector.broadcast %3 : vector<1x64xf32> to vector<16x64xf32>
    %5 = arith.addf %2, %4 : vector<16x64xf32>
    %cst_5 = arith.constant 0.000000e+00 : f32
    %6 = vector.broadcast %cst_5 : f32 to vector<16x64xf32>
    %7 = arith.maximumf %5, %6 : vector<16x64xf32>
    %c0_6 = arith.constant 0 : index
    %c0_7 = arith.constant 0 : index
    %8 = vector.load %arg4[%c0_6, %c0_7] : memref<64x64xf32, #tpu.memory_space<vmem>>, vector<64x64xf32>
    %cst_8 = arith.constant dense<0.000000e+00> : vector<16x64xf32>
    %9 = tpu.matmul %7, %8, %cst_8 {dimension_numbers = #tpu.dot_dimension_numbers<[1], [0], [0], [1], [0, 0, 1, 1], [], []>} : vector<16x64xf32>, vector<64x64xf32>, vector<16x64xf32> -> vector<16x64xf32>
    %c0_9 = arith.constant 0 : index
    %c0_10 = arith.constant 0 : index
    %10 = vector.load %arg5[%c0_9, %c0_10] : memref<1x64xf32, #tpu.memory_space<vmem>>, vector<1x64xf32>
    %11 = vector.broadcast %10 : vector<1x64xf32> to vector<16x64xf32>
    %12 = arith.addf %9, %11 : vector<16x64xf32>
    %cst_11 = arith.constant 0.000000e+00 : f32
    %13 = vector.broadcast %cst_11 : f32 to vector<16x64xf32>
    %14 = arith.maximumf %12, %13 : vector<16x64xf32>
    %c0_12 = arith.constant 0 : index
    %c0_13 = arith.constant 0 : index
    %15 = vector.load %arg6[%c0_12, %c0_13] : memref<64x128xf32, #tpu.memory_space<vmem>>, vector<64x128xf32>
    %cst_14 = arith.constant dense<0.000000e+00> : vector<16x128xf32>
    %16 = tpu.matmul %14, %15, %cst_14 {dimension_numbers = #tpu.dot_dimension_numbers<[1], [0], [0], [1], [0, 0, 1, 1], [], []>} : vector<16x64xf32>, vector<64x128xf32>, vector<16x128xf32> -> vector<16x128xf32>
    %c0_15 = arith.constant 0 : index
    %c0_16 = arith.constant 0 : index
    %17 = vector.load %arg7[%c0_15, %c0_16] : memref<1x128xf32, #tpu.memory_space<vmem>>, vector<1x128xf32>
    %18 = vector.broadcast %17 : vector<1x128xf32> to vector<16x128xf32>
    %19 = arith.addf %16, %18 : vector<16x128xf32>
    %c0_17 = arith.constant 0 : index
    %c0_18 = arith.constant 0 : index
    %20 = vector.load %arg8[%c0_17, %c0_18] : memref<16x128xf32, #tpu.memory_space<vmem>>, vector<16x128xf32>
    tpu.vector_store %arg8[%c0_17, %c0_18], %19 {strides = array<i32>} : memref<16x128xf32, #tpu.memory_space<vmem>>, vector<16x128xf32>,
    return
  }
  func.func @transform_0(%arg0: i32) -> (i32, i32) {
    %c0_i32 = arith.constant 0 : i32
    %c0_i32_0 = arith.constant 0 : i32
    return %arg0, %c0_i32 : i32, i32
  }
  func.func @transform_1(%arg0: i32) -> (i32, i32) {
    %c0_i32 = arith.constant 0 : i32
    %c0_i32_0 = arith.constant 0 : i32
    %c0_i32_1 = arith.constant 0 : i32
    return %c0_i32, %c0_i32_0 : i32, i32
  }
  func.func @transform_2(%arg0: i32) -> (i32, i32) {
    %c0_i32 = arith.constant 0 : i32
    %c0_i32_0 = arith.constant 0 : i32
    %c0_i32_1 = arith.constant 0 : i32
    return %c0_i32, %c0_i32_0 : i32, i32
  }
  func.func @transform_3(%arg0: i32) -> (i32, i32) {
    %c0_i32 = arith.constant 0 : i32
    %c0_i32_0 = arith.constant 0 : i32
    %c0_i32_1 = arith.constant 0 : i32
    return %c0_i32, %c0_i32_0 : i32, i32
  }
  func.func @transform_4(%arg0: i32) -> (i32, i32) {
    %c0_i32 = arith.constant 0 : i32
    %c0_i32_0 = arith.constant 0 : i32
    %c0_i32_1 = arith.constant 0 : i32
    return %c0_i32, %c0_i32_0 : i32, i32
  }
  func.func @transform_5(%arg0: i32) -> (i32, i32) {
    %c0_i32 = arith.constant 0 : i32
    %c0_i32_0 = arith.constant 0 : i32
    %c0_i32_1 = arith.constant 0 : i32
    return %c0_i32, %c0_i32_0 : i32, i32
  }
  func.func @transform_6(%arg0: i32) -> (i32, i32) {
    %c0_i32 = arith.constant 0 : i32
    %c0_i32_0 = arith.constant 0 : i32
    %c0_i32_1 = arith.constant 0 : i32
    return %c0_i32, %c0_i32_0 : i32, i32
  }
  func.func @transform_7(%arg0: i32) -> (i32, i32) {
    %c0_i32 = arith.constant 0 : i32
    %c0_i32_0 = arith.constant 0 : i32
    return %arg0, %c0_i32 : i32, i32
  }
}

</mosaic_0001>

<bundles_post_ra>
// kernel: tpu_custom_call.1
= control target key start
LH: loop header
LB: loop body
LE: loop exit
PB: predicated region body
PF: predicated region fallthrough
CT: control target
= control target key end

     0   :  { %12 = vsyncpa [#allocation3], 0  ;;  %s686_s0 = inlined_call_operand.hbm [shape: f32[16,32], index: 0, kind: input, shape index: {}]   ;;  %s687_s1 = inlined_call_operand.hbm [shape: f32[32,64], index: 1, kind: input, shape index: {}]   ;;  %s688_s2 = inlined_call_operand.vmem [shape: f32[1,64], index: 2, kind: input, shape index: {}]   ;;  %s689_s3 = inlined_call_operand.hbm [shape: f32[64,64], index: 3, kind: input, shape index: {}]   ;;  %s690_s4 = inlined_call_operand.vmem [shape: f32[1,64], index: 4, kind: input, shape index: {}]   ;;  %s691_s5 = inlined_call_operand.hbm [shape: f32[64,128], index: 5, kind: input, shape index: {}]   ;;  %s692_s6 = inlined_call_operand.vmem [shape: f32[1,128], index: 6, kind: input, shape index: {}]   ;;  %s693_s7 = inlined_call_operand.hbm [shape: f32[16,128], index: 7, kind: output, shape index: {}]  }
   0x1   :  { %13 = vsyncpa [#allocation6], 0 }
   0x2   :  { %14 = vsyncpa [#allocation9], 0 }
   0x3   :  { %15 = vsyncpa [#allocation4], 0  ;;  %s594_s24 = smov [#allocation5]   ;;  %s595_s26 = smov [#allocation2]  }
   0x4   :  { %s33_s25 = sshll.u32 %s594_s24, 4  ;;  %s21_s27 = sshll.u32 %s595_s26, 4  ;;  %s34_s25 = int_to_ptr.vmem [resolvable:$true] %s33_s25  ;;  %s22_s27 = int_to_ptr.vmem [resolvable:$true] %s21_s27 }
   0x5   :  { %s494_s28 = scalar_lea.vmem %s34_s25, 512  ;;  %p499_p1 = scmp.lt.s32.totalorder %s34_s25, %s34_s25 }
   0x6   :  { %p495_p0 = scmp.ne.s32.totalorder %s34_s25, %s494_s28  ;;  %p500_p2 = scmp.lt.s32.totalorder %s494_s28, %s494_s28 }
   0x8   :  { %p501_p3 = por %p500_p2, %p499_p1 }
   0xa   :  { %p502_p4 = pnand %p501_p3, %p495_p0 }
   0xc   :  { %505 = shalt.err (!%p502_p4)
}
   0xd   :  { %s596_s29 = smov 128   ;;  %s597_s30 = smov 8  }
   0xe   :  { %39 = dma.hbm_to_vmem [thread:$0]  %s687_s1, 512, %s34_s25, [#allocation6], %s596_s29, %s596_s29, %s597_s30  }
   0xf   :  { %s514_s10 = scalar_lea.vmem %s22_s27, 256  ;;  %p519_p6 = scmp.lt.s32.totalorder %s22_s27, %s22_s27 }
  0x10   :  { %p515_p5 = scmp.ne.s32.totalorder %s22_s27, %s514_s10  ;;  %p520_p7 = scmp.lt.s32.totalorder %s514_s10, %s514_s10 }
  0x12   :  { %p521_p8 = por %p520_p7, %p519_p6 }
  0x14   :  { %p522_p9 = pnand %p521_p8, %p515_p5 }
  0x16   :  { %525 = shalt.err (!%p522_p9)
}
  0x17   :  { %27 = dma.hbm_to_vmem [thread:$0]  %s686_s0, 256, %s22_s27, [#allocation3], %s596_s29, %s596_s29, %s597_s30  }
  0x18   :  { %s598_s13 = smov [#allocation7]   ;;  %s599_s15 = smov [#allocation8]  }
  0x19   :  { %s47_s14 = sshll.u32 %s598_s13, 4  ;;  %s61_s16 = sshll.u32 %s599_s15, 4  ;;  %s48_s14 = int_to_ptr.vmem [resolvable:$true] %s47_s14  ;;  %s62_s16 = int_to_ptr.vmem [resolvable:$true] %s61_s16 }
  0x1a   :  { %s534_s1 = scalar_lea.vmem %s48_s14, 1024  ;;  %p539_p11 = scmp.lt.s32.totalorder %s48_s14, %s48_s14 }
  0x1b   :  { %p535_p10 = scmp.ne.s32.totalorder %s48_s14, %s534_s1  ;;  %p540_p12 = scmp.lt.s32.totalorder %s534_s1, %s534_s1 }
  0x1d   :  { %p541_p13 = por %p540_p12, %p539_p11 }
  0x1f   :  { %p542_p0 = pnand %p541_p13, %p535_p10 }
  0x21   :  { %545 = shalt.err (!%p542_p0)
}
  0x22   :  { %53 = dma.hbm_to_vmem [thread:$0]  %s689_s3, 1024, %s48_s14, [#allocation6], %s596_s29, %s596_s29, %s597_s30  }
  0x23   :  { %s554_s0 = scalar_lea.vmem %s62_s16, 1024  ;;  %p559_p2 = scmp.lt.s32.totalorder %s62_s16, %s62_s16 }
  0x24   :  { %p555_p1 = scmp.ne.s32.totalorder %s62_s16, %s554_s0  ;;  %p560_p3 = scmp.lt.s32.totalorder %s554_s0, %s554_s0 }
  0x26   :  { %p561_p4 = por %p560_p3, %p559_p2 }
  0x28   :  { %p562_p5 = pnand %p561_p4, %p555_p1 }
  0x2a   :  { %565 = shalt.err (!%p562_p5)
}
  0x2b   :  { %67 = dma.hbm_to_vmem [thread:$0]  %s691_s5, 1024, %s62_s16, [#allocation9], %s596_s29, %s596_s29, %s597_s30  }
  0x2c   :  { %586 = dma.done.wait [#allocation3], 256  }
  0x2d   :  { %587 = vsyncadd [#allocation3], 4294967040 }
  0x2e   :  { %588 = dma.done.wait [#allocation6], 1536  }
  0x2f   :  { %589 = vsyncadd [#allocation6], 4294965760 }
  0x30   :  { %590 = dma.done.wait [#allocation9], 1024  }
  0x31   :  { %591 = vsyncadd [#allocation9], 4294966272  ;;  %vm95_vm0 = vcmask 261120   ;;  %v87_v0 = vld [vmem:[#allocation5 + $0x18] sm:$0xff]  ;;  %v86_v1 = vld [vmem:[#allocation5 + $0x10] sm:$0xff]  ;;  %vm194_vm1 = vcmask 523264  }
  0x32   :  { %430 = vmatprep.subr.mxu0 %v87_v0  ;;  %v82_v2 = vld [vmem:[#allocation2] sm:$0xff]  ;;  %v85_v3 = vld [vmem:[#allocation5 + $0x8] sm:$0xff]  ;;  %v186_v4 = vld [vmem:[#allocation7 + $0x38] sm:$0xff]  ;;  %s600_s24 = smov [#allocation10]  }
  0x33   :  { %431 = vmatpush3.msra.mxu0 %v87_v0  ;;  %438 = vmatprep.mubr.msk.f32.mxu0 %vm95_vm0, %v82_v2  ;;  %v185_v5 = vld [vmem:[#allocation7 + $0x30] sm:$0xff]  ;;  %v84_v6 = vld [vmem:[#allocation5] sm:$0xff]  ;;  %v184_v7 = vld [vmem:[#allocation7 + $0x28] sm:$0xff]  ;;  %s381_s25 = sshll.u32 %s600_s24, 4  ;;  %s382_s25 = int_to_ptr.vmem [resolvable:$true] %s381_s25 }
  0x34   :  { %432 = vmatprep.subr.mxu0 %v86_v1  ;;  %441 = vmatprep.subr.mxu1 %v186_v4  ;;  %v83_v8 = vld [vmem:[#allocation2 + $0x8] sm:$0xff]  ;;  %v183_v9 = vld [vmem:[#allocation7 + $0x20] sm:$0xff]  ;;  %v181_v11 = vld [vmem:[#allocation7 + $0x10] sm:$0xff]  ;;  %p571_p7 = scmp.lt.s32.totalorder %s382_s25, %s382_s25 }
  0x35   :  { %433 = vmatpush3.msra.mxu0 %v86_v1  ;;  %442 = vmatpush3.msra.mxu1 %v186_v4  ;;  %v182_v10 = vld [vmem:[#allocation7 + $0x18] sm:$0xff]  ;;  %v180_v12 = vld [vmem:[#allocation7 + $0x8] sm:$0xff]  ;;  %v179_v13 = vld [vmem:[#allocation7] sm:$0xff] }
  0x36   :  { %434 = vmatprep.subr.mxu0 %v85_v3  ;;  %443 = vmatprep.subr.mxu1 %v185_v5  ;;  %v285_v14 = vld [vmem:[#allocation8 + $0x38] sm:$0xff]  ;;  %v284_v15 = vld [vmem:[#allocation8 + $0x30] sm:$0xff]  ;;  %v283_v16 = vld [vmem:[#allocation8 + $0x28] sm:$0xff] }
  0x37   :  { %435 = vmatpush3.msra.mxu0 %v85_v3  ;;  %444 = vmatpush3.msra.mxu1 %v185_v5  ;;  %v282_v17 = vld [vmem:[#allocation8 + $0x20] sm:$0xff]  ;;  %v395_v18 = vld [vmem:[%s688_s2] ss:$0 sm:$0xff]  ;;  %v281_v25 = vld [vmem:[#allocation8 + $0x18] sm:$0xff] }
  0x38   :  { %436 = vmatprep.subr.mxu0 %v84_v6  ;;  %445 = vmatprep.subr.mxu1 %v184_v7  ;;  %v280_v26 = vld [vmem:[#allocation8 + $0x10] sm:$0xff]  ;;  %v279_v27 = vld [vmem:[#allocation8 + $0x8] sm:$0xff]  ;;  %v278_v28 = vld [vmem:[#allocation8] sm:$0xff] }
  0x39   :  { %437 = vmatpush3.msra.mxu0 %v84_v6  ;;  %446 = vmatpush3.msra.mxu1 %v184_v7  ;;  %v398_v29 = vld [vmem:[%s690_s4] ss:$0 sm:$0xff]  ;;  %s566_s4 = scalar_lea.vmem %s382_s25, 256 }
  0x3a   :  { %439 = vmatmul.mubr.msk.f32.vlgmr.msra.gmra.mxu0 %vm95_vm0, %v83_v8  ;;  %447 = vmatprep.subr.mxu1 %v183_v9  ;;  %v401_v36 = vld [vmem:[%s692_s6] ss:$0 sm:$0xff]  ;;  %p567_p6 = scmp.ne.s32.totalorder %s382_s25, %s566_s4  ;;  %p572_p8 = scmp.lt.s32.totalorder %s566_s4, %s566_s4 }
  0x3b   :  { %448 = vmatpush3.msra.mxu1 %v183_v9  ;;  %460 = vmatprep.subr.mxu0 %v285_v14 }
  0x3c   :  { %449 = vmatprep.subr.mxu1 %v182_v10  ;;  %461 = vmatpush3.msra.mxu0 %v285_v14  ;;  %p573_p9 = por %p572_p8, %p571_p7 }
  0x3d   :  { %450 = vmatpush3.msra.mxu1 %v182_v10  ;;  %462 = vmatprep.subr.mxu0 %v284_v15 }
  0x3e   :  { %451 = vmatprep.subr.mxu1 %v181_v11  ;;  %463 = vmatpush3.msra.mxu0 %v284_v15  ;;  %p574_p10 = pnand %p573_p9, %p567_p6 }
  0x3f   :  { %452 = vmatpush3.msra.mxu1 %v181_v11  ;;  %464 = vmatprep.subr.mxu0 %v283_v16 }
  0x40   :  { %453 = vmatprep.subr.mxu1 %v180_v12  ;;  %465 = vmatpush3.msra.mxu0 %v283_v16 }
  0x41   :  { %454 = vmatpush3.msra.mxu1 %v180_v12  ;;  %466 = vmatprep.subr.mxu0 %v282_v17 }
  0x42   :  { %455 = vmatprep.subr.mxu1 %v179_v13  ;;  %467 = vmatpush3.msra.mxu0 %v282_v17 }
  0x43   :  { %456 = vmatpush3.msra.mxu1 %v179_v13  ;;  %468 = vmatprep.subr.mxu0 %v281_v25 }
  0x44   :  { %469 = vmatpush3.msra.mxu0 %v281_v25 }
  0x45   :  { %470 = vmatprep.subr.mxu0 %v280_v26 }
  0x46   :  { %471 = vmatpush3.msra.mxu0 %v280_v26 }
  0x47   :  { %472 = vmatprep.subr.mxu0 %v279_v27 }
  0x48   :  { %473 = vmatpush3.msra.mxu0 %v279_v27 }
  0x49   :  { %474 = vmatprep.subr.mxu0 %v278_v28 }
  0x4a   :  { %475 = vmatpush3.msra.mxu0 %v278_v28 }
  0xfa   :  { %v440_v19 = vpop.f32.mrf.mxu0 }
  0xfb   :  { %v174_v20 = vadd.f32 %v440_v19, %v395_v18 }
  0xfc   :  { %v168_v21 = vpop.f32.mrf.mxu0 }
  0xfd   :  { %v169_v22 = vadd.f32 %v395_v18, %v168_v21  ;;  %v178_v24 = vmax.f32 %v174_v20, 0.0 }
  0xff   :  { %v177_v23 = vmax.f32 %v169_v22, 0.0 }
 0x101   :  { %457 = vmatprep.mubr.msk.f32.mxu1 %vm194_vm1, %v177_v23 }
 0x102   :  { %458 = vmatmul.mubr.msk.f32.vlgmr.msra.gmra.mxu1 %vm194_vm1, %v178_v24 }
 0x1c2   :  { %v459_v30 = vpop.f32.mrf.mxu1 }
 0x1c3   :  { %v273_v31 = vadd.f32 %v459_v30, %v398_v29 }
 0x1c4   :  { %v267_v32 = vpop.f32.mrf.mxu1 }
 0x1c5   :  { %v268_v33 = vadd.f32 %v398_v29, %v267_v32  ;;  %v277_v35 = vmax.f32 %v273_v31, 0.0 }
 0x1c7   :  { %v276_v34 = vmax.f32 %v268_v33, 0.0 }
 0x1c9   :  { %476 = vmatprep.mubr.msk.f32.mxu0 %vm194_vm1, %v276_v34 }
 0x1ca   :  { %477 = vmatmul.mubr.msk.f32.vlgmr.msra.gmra.mxu0 %vm194_vm1, %v277_v35 }
 0x28a   :  { %v478_v37 = vpop.f32.mrf.mxu0 }
 0x28b   :  { %v371_v38 = vadd.f32 %v478_v37, %v401_v36 }
 0x28c   :  { %v365_v39 = vpop.f32.mrf.mxu0 }
 0x28d   :  { %375 = vst [vmem:[#allocation10 + $0x8] sm:$0xff] %v371_v38  ;;  %v366_v40 = vadd.f32 %v401_v36, %v365_v39 }
 0x28f   :  { %374 = vst [vmem:[#allocation10] sm:$0xff] %v366_v40 }
 0x290   :  { %577 = shalt.err (!%p574_p10)
}
 0x291   :  { %387 = dma.vmem_to_hbm [thread:$0]  %s382_s25, 256, %s693_s7, [#allocation4], %s596_s29, %s596_s29, %s597_s30  }
 0x292   :  { %592 = dma.done.wait [#allocation4], 256  }
 0x293   :  { %593 = vsyncadd [#allocation4], 4294967040 }
 0x294   :  { %391 = vsyncpa [#allocation3], 1 }
 0x295   :  { %392 = vsyncpa [#allocation6], 1 }
 0x296   :  { %393 = vsyncpa [#allocation9], 1 }
 0x297   :  { %394 = vsyncpa [#allocation4], 1 }

// kernel: tpu_custom_call.1
= control target key start
LH: loop header
LB: loop body
LE: loop exit
PB: predicated region body
PF: predicated region fallthrough
CT: control target
= control target key end

     0   :  { %12 = vsyncpa [#allocation3], 0  ;;  %s686_s0 = inlined_call_operand.hbm [shape: f32[16,32], index: 0, kind: input, shape index: {}]   ;;  %s687_s1 = inlined_call_operand.hbm [shape: f32[32,64], index: 1, kind: input, shape index: {}]   ;;  %s688_s2 = inlined_call_operand.vmem [shape: f32[1,64], index: 2, kind: input, shape index: {}]   ;;  %s689_s3 = inlined_call_operand.hbm [shape: f32[64,64], index: 3, kind: input, shape index: {}]   ;;  %s690_s4 = inlined_call_operand.vmem [shape: f32[1,64], index: 4, kind: input, shape index: {}]   ;;  %s691_s5 = inlined_call_operand.hbm [shape: f32[64,128], index: 5, kind: input, shape index: {}]   ;;  %s692_s6 = inlined_call_operand.vmem [shape: f32[1,128], index: 6, kind: input, shape index: {}]   ;;  %s693_s7 = inlined_call_operand.hbm [shape: f32[16,128], index: 7, kind: output, shape index: {}]  }
   0x1   :  { %13 = vsyncpa [#allocation6], 0 }
   0x2   :  { %14 = vsyncpa [#allocation9], 0 }
   0x3   :  { %15 = vsyncpa [#allocation4], 0  ;;  %s594_s24 = smov [#allocation5]   ;;  %s595_s26 = smov [#allocation2]  }
   0x4   :  { %s33_s25 = sshll.u32 %s594_s24, 4  ;;  %s21_s27 = sshll.u32 %s595_s26, 4  ;;  %s34_s25 = int_to_ptr.vmem [resolvable:$true] %s33_s25  ;;  %s22_s27 = int_to_ptr.vmem [resolvable:$true] %s21_s27 }
   0x5   :  { %s494_s28 = scalar_lea.vmem %s34_s25, 512  ;;  %p499_p1 = scmp.lt.s32.totalorder %s34_s25, %s34_s25 }
   0x6   :  { %p495_p0 = scmp.ne.s32.totalorder %s34_s25, %s494_s28  ;;  %p500_p2 = scmp.lt.s32.totalorder %s494_s28, %s494_s28 }
   0x8   :  { %p501_p3 = por %p500_p2, %p499_p1 }
   0xa   :  { %p502_p4 = pnand %p501_p3, %p495_p0 }
   0xc   :  { %505 = shalt.err (!%p502_p4)
}
   0xd   :  { %s596_s29 = smov 128   ;;  %s597_s30 = smov 8  }
   0xe   :  { %39 = dma.hbm_to_vmem [thread:$0]  %s687_s1, 512, %s34_s25, [#allocation6], %s596_s29, %s596_s29, %s597_s30  }
   0xf   :  { %s514_s10 = scalar_lea.vmem %s22_s27, 256  ;;  %p519_p6 = scmp.lt.s32.totalorder %s22_s27, %s22_s27 }
  0x10   :  { %p515_p5 = scmp.ne.s32.totalorder %s22_s27, %s514_s10  ;;  %p520_p7 = scmp.lt.s32.totalorder %s514_s10, %s514_s10 }
  0x12   :  { %p521_p8 = por %p520_p7, %p519_p6 }
  0x14   :  { %p522_p9 = pnand %p521_p8, %p515_p5 }
  0x16   :  { %525 = shalt.err (!%p522_p9)
}
  0x17   :  { %27 = dma.hbm_to_vmem [thread:$0]  %s686_s0, 256, %s22_s27, [#allocation3], %s596_s29, %s596_s29, %s597_s30  }
  0x18   :  { %s598_s13 = smov [#allocation7]   ;;  %s599_s15 = smov [#allocation8]  }
  0x19   :  { %s47_s14 = sshll.u32 %s598_s13, 4  ;;  %s61_s16 = sshll.u32 %s599_s15, 4  ;;  %s48_s14 = int_to_ptr.vmem [resolvable:$true] %s47_s14  ;;  %s62_s16 = int_to_ptr.vmem [resolvable:$true] %s61_s16 }
  0x1a   :  { %s534_s1 = scalar_lea.vmem %s48_s14, 1024  ;;  %p539_p11 = scmp.lt.s32.totalorder %s48_s14, %s48_s14 }
  0x1b   :  { %p535_p10 = scmp.ne.s32.totalorder %s48_s14, %s534_s1  ;;  %p540_p12 = scmp.lt.s32.totalorder %s534_s1, %s534_s1 }
  0x1d   :  { %p541_p13 = por %p540_p12, %p539_p11 }
  0x1f   :  { %p542_p0 = pnand %p541_p13, %p535_p10 }
  0x21   :  { %545 = shalt.err (!%p542_p0)
}
  0x22   :  { %53 = dma.hbm_to_vmem [thread:$0]  %s689_s3, 1024, %s48_s14, [#allocation6], %s596_s29, %s596_s29, %s597_s30  }
  0x23   :  { %s554_s0 = scalar_lea.vmem %s62_s16, 1024  ;;  %p559_p2 = scmp.lt.s32.totalorder %s62_s16, %s62_s16 }
  0x24   :  { %p555_p1 = scmp.ne.s32.totalorder %s62_s16, %s554_s0  ;;  %p560_p3 = scmp.lt.s32.totalorder %s554_s0, %s554_s0 }
  0x26   :  { %p561_p4 = por %p560_p3, %p559_p2 }
  0x28   :  { %p562_p5 = pnand %p561_p4, %p555_p1 }
  0x2a   :  { %565 = shalt.err (!%p562_p5)
}
  0x2b   :  { %67 = dma.hbm_to_vmem [thread:$0]  %s691_s5, 1024, %s62_s16, [#allocation9], %s596_s29, %s596_s29, %s597_s30  }
  0x2c   :  { %586 = dma.done.wait [#allocation3], 256  }
  0x2d   :  { %587 = vsyncadd [#allocation3], 4294967040 }
  0x2e   :  { %588 = dma.done.wait [#allocation6], 1536  }
  0x2f   :  { %589 = vsyncadd [#allocation6], 4294965760 }
  0x30   :  { %590 = dma.done.wait [#allocation9], 1024  }
  0x31   :  { %591 = vsyncadd [#allocation9], 4294966272  ;;  %vm95_vm0 = vcmask 261120   ;;  %v87_v0 = vld [vmem:[#allocation5 + $0x18] sm:$0xff]  ;;  %v86_v1 = vld [vmem:[#allocation5 + $0x10] sm:$0xff]  ;;  %vm194_vm1 = vcmask 523264  }
  0x32   :  { %430 = vmatprep.subr.mxu0 %v87_v0  ;;  %v82_v2 = vld [vmem:[#allocation2] sm:$0xff]  ;;  %v85_v3 = vld [vmem:[#allocation5 + $0x8] sm:$0xff]  ;;  %v186_v4 = vld [vmem:[#allocation7 + $0x38] sm:$0xff]  ;;  %s600_s24 = smov [#allocation10]  }
  0x33   :  { %431 = vmatpush3.msra.mxu0 %v87_v0  ;;  %438 = vmatprep.mubr.msk.f32.mxu0 %vm95_vm0, %v82_v2  ;;  %v185_v5 = vld [vmem:[#allocation7 + $0x30] sm:$0xff]  ;;  %v84_v6 = vld [vmem:[#allocation5] sm:$0xff]  ;;  %v184_v7 = vld [vmem:[#allocation7 + $0x28] sm:$0xff]  ;;  %s381_s25 = sshll.u32 %s600_s24, 4  ;;  %s382_s25 = int_to_ptr.vmem [resolvable:$true] %s381_s25 }
  0x34   :  { %432 = vmatprep.subr.mxu0 %v86_v1  ;;  %441 = vmatprep.subr.mxu1 %v186_v4  ;;  %v83_v8 = vld [vmem:[#allocation2 + $0x8] sm:$0xff]  ;;  %v183_v9 = vld [vmem:[#allocation7 + $0x20] sm:$0xff]  ;;  %v181_v11 = vld [vmem:[#allocation7 + $0x10] sm:$0xff]  ;;  %p571_p7 = scmp.lt.s32.totalorder %s382_s25, %s382_s25 }
  0x35   :  { %433 = vmatpush3.msra.mxu0 %v86_v1  ;;  %442 = vmatpush3.msra.mxu1 %v186_v4  ;;  %v182_v10 = vld [vmem:[#allocation7 + $0x18] sm:$0xff]  ;;  %v180_v12 = vld [vmem:[#allocation7 + $0x8] sm:$0xff]  ;;  %v179_v13 = vld [vmem:[#allocation7] sm:$0xff] }
  0x36   :  { %434 = vmatprep.subr.mxu0 %v85_v3  ;;  %443 = vmatprep.subr.mxu1 %v185_v5  ;;  %v285_v14 = vld [vmem:[#allocation8 + $0x38] sm:$0xff]  ;;  %v284_v15 = vld [vmem:[#allocation8 + $0x30] sm:$0xff]  ;;  %v283_v16 = vld [vmem:[#allocation8 + $0x28] sm:$0xff] }
  0x37   :  { %435 = vmatpush3.msra.mxu0 %v85_v3  ;;  %444 = vmatpush3.msra.mxu1 %v185_v5  ;;  %v282_v17 = vld [vmem:[#allocation8 + $0x20] sm:$0xff]  ;;  %v395_v18 = vld [vmem:[%s688_s2] ss:$0 sm:$0xff]  ;;  %v281_v25 = vld [vmem:[#allocation8 + $0x18] sm:$0xff] }
  0x38   :  { %436 = vmatprep.subr.mxu0 %v84_v6  ;;  %445 = vmatprep.subr.mxu1 %v184_v7  ;;  %v280_v26 = vld [vmem:[#allocation8 + $0x10] sm:$0xff]  ;;  %v279_v27 = vld [vmem:[#allocation8 + $0x8] sm:$0xff]  ;;  %v278_v28 = vld [vmem:[#allocation8] sm:$0xff] }
  0x39   :  { %437 = vmatpush3.msra.mxu0 %v84_v6  ;;  %446 = vmatpush3.msra.mxu1 %v184_v7  ;;  %v398_v29 = vld [vmem:[%s690_s4] ss:$0 sm:$0xff]  ;;  %s566_s4 = scalar_lea.vmem %s382_s25, 256 }
  0x3a   :  { %439 = vmatmul.mubr.msk.f32.vlgmr.msra.gmra.mxu0 %vm95_vm0, %v83_v8  ;;  %447 = vmatprep.subr.mxu1 %v183_v9  ;;  %v401_v36 = vld [vmem:[%s692_s6] ss:$0 sm:$0xff]  ;;  %p567_p6 = scmp.ne.s32.totalorder %s382_s25, %s566_s4  ;;  %p572_p8 = scmp.lt.s32.totalorder %s566_s4, %s566_s4 }
  0x3b   :  { %448 = vmatpush3.msra.mxu1 %v183_v9  ;;  %460 = vmatprep.subr.mxu0 %v285_v14 }
  0x3c   :  { %449 = vmatprep.subr.mxu1 %v182_v10  ;;  %461 = vmatpush3.msra.mxu0 %v285_v14  ;;  %p573_p9 = por %p572_p8, %p571_p7 }
  0x3d   :  { %450 = vmatpush3.msra.mxu1 %v182_v10  ;;  %462 = vmatprep.subr.mxu0 %v284_v15 }
  0x3e   :  { %451 = vmatprep.subr.mxu1 %v181_v11  ;;  %463 = vmatpush3.msra.mxu0 %v284_v15  ;;  %p574_p10 = pnand %p573_p9, %p567_p6 }
  0x3f   :  { %452 = vmatpush3.msra.mxu1 %v181_v11  ;;  %464 = vmatprep.subr.mxu0 %v283_v16 }
  0x40   :  { %453 = vmatprep.subr.mxu1 %v180_v12  ;;  %465 = vmatpush3.msra.mxu0 %v283_v16 }
  0x41   :  { %454 = vmatpush3.msra.mxu1 %v180_v12  ;;  %466 = vmatprep.subr.mxu0 %v282_v17 }
  0x42   :  { %455 = vmatprep.subr.mxu1 %v179_v13  ;;  %467 = vmatpush3.msra.mxu0 %v282_v17 }
  0x43   :  { %456 = vmatpush3.msra.mxu1 %v179_v13  ;;  %468 = vmatprep.subr.mxu0 %v281_v25 }
  0x44   :  { %469 = vmatpush3.msra.mxu0 %v281_v25 }
  0x45   :  { %470 = vmatprep.subr.mxu0 %v280_v26 }
  0x46   :  { %471 = vmatpush3.msra.mxu0 %v280_v26 }
  0x47   :  { %472 = vmatprep.subr.mxu0 %v279_v27 }
  0x48   :  { %473 = vmatpush3.msra.mxu0 %v279_v27 }
  0x49   :  { %474 = vmatprep.subr.mxu0 %v278_v28 }
  0x4a   :  { %475 = vmatpush3.msra.mxu0 %v278_v28 }
  0xfa   :  { %v440_v19 = vpop.f32.mrf.mxu0 }
  0xfb   :  { %v174_v20 = vadd.f32 %v440_v19, %v395_v18 }
  0xfc   :  { %v168_v21 = vpop.f32.mrf.mxu0 }
  0xfd   :  { %v169_v22 = vadd.f32 %v395_v18, %v168_v21  ;;  %v178_v24 = vmax.f32 %v174_v20, 0.0 }
  0xff   :  { %v177_v23 = vmax.f32 %v169_v22, 0.0 }
 0x101   :  { %457 = vmatprep.mubr.msk.f32.mxu1 %vm194_vm1, %v177_v23 }
 0x102   :  { %458 = vmatmul.mubr.msk.f32.vlgmr.msra.gmra.mxu1 %vm194_vm1, %v178_v24 }
 0x1c2   :  { %v459_v30 = vpop.f32.mrf.mxu1 }
 0x1c3   :  { %v273_v31 = vadd.f32 %v459_v30, %v398_v29 }
 0x1c4   :  { %v267_v32 = vpop.f32.mrf.mxu1 }
 0x1c5   :  { %v268_v33 = vadd.f32 %v398_v29, %v267_v32  ;;  %v277_v35 = vmax.f32 %v273_v31, 0.0 }
 0x1c7   :  { %v276_v34 = vmax.f32 %v268_v33, 0.0 }
 0x1c9   :  { %476 = vmatprep.mubr.msk.f32.mxu0 %vm194_vm1, %v276_v34 }
 0x1ca   :  { %477 = vmatmul.mubr.msk.f32.vlgmr.msra.gmra.mxu0 %vm194_vm1, %v277_v35 }
 0x28a   :  { %v478_v37 = vpop.f32.mrf.mxu0 }
 0x28b   :  { %v371_v38 = vadd.f32 %v478_v37, %v401_v36 }
 0x28c   :  { %v365_v39 = vpop.f32.mrf.mxu0 }
 0x28d   :  { %375 = vst [vmem:[#allocation10 + $0x8] sm:$0xff] %v371_v38  ;;  %v366_v40 = vadd.f32 %v401_v36, %v365_v39 }
 0x28f   :  { %374 = vst [vmem:[#allocation10] sm:$0xff] %v366_v40 }
 0x290   :  { %577 = shalt.err (!%p574_p10)
}
 0x291   :  { %387 = dma.vmem_to_hbm [thread:$0]  %s382_s25, 256, %s693_s7, [#allocation4], %s596_s29, %s596_s29, %s597_s30  }
 0x292   :  { %592 = dma.done.wait [#allocation4], 256  }
 0x293   :  { %593 = vsyncadd [#allocation4], 4294967040 }
 0x294   :  { %391 = vsyncpa [#allocation3], 1 }
 0x295   :  { %392 = vsyncpa [#allocation6], 1 }
 0x296   :  { %393 = vsyncpa [#allocation9], 1 }
 0x297   :  { %394 = vsyncpa [#allocation4], 1 }

</bundles_post_ra>
